<compile_context>
chip_gen: v7x
topology: tpu7x:2x2x1
jax: 0.10.0
libtpu: 0.0.40
codegen_flags: <defaults>
</compile_context>

<pallas_src>
import functools

import jax
import jax.numpy as jnp
import numpy as np
from jax.experimental import pallas as pl
from jax.experimental.pallas import tpu as pltpu


# ----------------------------------------------------------------------------
# Kernel 1: hoisted input projection  xg = x2d @ W_ih^T + (b_ih + b_hh)
# ----------------------------------------------------------------------------
def _input_proj_kernel(x_ref, w_ref, b_ref, o_ref):
    o_ref[...] = (
        jnp.dot(x_ref[...], w_ref[...], preferred_element_type=jnp.float32)
        + b_ref[...]
    ).astype(o_ref.dtype)


def input_projection(x2d, w_ih_t, bias_row):
    """(T*B, I) x (I, 4H) + bias -> (T*B, 4H) in f32, row-tiled over the grid."""
    TB, I = x2d.shape
    G = w_ih_t.shape[1]
    tile_r = TB
    for cand in (1024, 512, 256, 128, 64, 32, 16, 8):
        if cand <= TB and TB % cand == 0:
            tile_r = cand
            break
    grid = (TB // tile_r,)
    return pl.pallas_call(
        _input_proj_kernel,
        out_shape=jax.ShapeDtypeStruct((TB, G), jnp.float32),
        grid=grid,
        in_specs=(
            pl.BlockSpec((tile_r, I), lambda r: (r, 0)),
            pl.BlockSpec((I, G), lambda r: (0, 0)),       # resident
            pl.BlockSpec((1, G), lambda r: (0, 0)),       # resident
        ),
        out_specs=pl.BlockSpec((tile_r, G), lambda r: (r, 0)),
        compiler_params=pltpu.CompilerParams(dimension_semantics=("parallel",)),
    )(x2d, w_ih_t, bias_row)


# ----------------------------------------------------------------------------
# Kernel 2: LSTM recurrence with fused weight-dropout on W_hh^T
# ----------------------------------------------------------------------------
def _lstm_recurrence_kernel(xg_ref, whh_ref, *rest,
                            apply_dropout, drop_thr, drop_scale):
    if apply_dropout:
        bits_ref, hseq_ref, cn_ref, whh_scr, h_scr, c_scr = rest
    else:
        hseq_ref, cn_ref, h_scr, c_scr = rest
        whh_scr = whh_ref                       # no dropout: use the resident input block

    H = h_scr.shape[-1]
    tile_t = xg_ref.shape[0]
    tblk = pl.program_id(0)

    @pl.when(tblk == 0)
    def _init():
        h_scr[...] = jnp.zeros_like(h_scr)
        c_scr[...] = jnp.zeros_like(c_scr)
        if apply_dropout:
            # Fused F.dropout on the weight: keep w/(1-p) where u >= p, else 0.
            # Threshold compare on the raw PRNG bits (31-bit), mask+scale in f32, one cast.
            keep = (bits_ref[...] >> jnp.uint32(1)).astype(jnp.int32) >= jnp.int32(drop_thr)
            w32 = whh_ref[...].astype(jnp.float32) * jnp.float32(drop_scale)
            whh_scr[...] = jnp.where(keep, w32, 0.0).astype(whh_scr.dtype)

    w_hh = whh_scr[...]                         # (H, 4H), resident across the whole grid
    h = h_scr[...]
    c = c_scr[...]
    # Fully-unrolled inner time loop (== lax.fori_loop(..., unroll=True)); static indices.
    for tt in range(tile_t):
        gates = xg_ref[tt] + jnp.dot(h.astype(w_hh.dtype), w_hh,
                                     preferred_element_type=jnp.float32)
        i = jax.nn.sigmoid(gates[:, 0 * H:1 * H])
        f = jax.nn.sigmoid(gates[:, 1 * H:2 * H])
        g = jnp.tanh(gates[:, 2 * H:3 * H])
        o = jax.nn.sigmoid(gates[:, 3 * H:4 * H])
        c = f * c + i * g
        h = o * jnp.tanh(c)
        hseq_ref[tt] = h.astype(hseq_ref.dtype)
    h_scr[...] = h
    c_scr[...] = c
    cn_ref[...] = c.astype(cn_ref.dtype)        # resident output, written back at grid end


def weight_dropped_lstm_forward(x, w_ih, w_hh_raw, b_ih, b_hh, *,
                                weight_p=0.0, training=True, rng_key=None,
                                matmul_dtype=jnp.float32, tile_t=None):
    """WeightDropout(nn.LSTM(I,H), p, ['weight_hh_l0']).forward(x), x time-major (T,B,I)."""
    T, B, I = x.shape
    G4, H = w_hh_raw.shape
    assert G4 == 4 * H and w_ih.shape == (G4, I)

    # One-time host-side layout prep (pre-transpose weights, fuse biases).
    w_ih_t = jnp.asarray(w_ih.T, dtype=matmul_dtype)            # (I, 4H)
    w_hh_t = jnp.asarray(w_hh_raw.T, dtype=matmul_dtype)        # (H, 4H)
    bias_row = (b_ih + b_hh).astype(jnp.float32).reshape(1, G4)

    # 1) Hoisted input projection: one large matmul instead of T tiny per-step matmuls.
    x2d = x.reshape(T * B, I).astype(matmul_dtype)
    xg = input_projection(x2d, w_ih_t, bias_row).reshape(T, B, G4)   # f32 gate inputs

    # 2) Sequential recurrence, TILE_T steps per grid iteration.
    if tile_t is None:
        tile_t = 1
        for cand in (32, 16, 8, 4, 2, 1):
            if cand <= T and T % cand == 0:
                tile_t = cand
                break
    grid = (T // tile_t,)

    apply_dropout = bool(training) and float(weight_p) > 0.0
    p = float(min(max(float(weight_p), 0.0), 0.999999))
    drop_thr = int(round(p * (1 << 31)))
    drop_scale = 1.0 / (1.0 - p)

    in_specs = [
        pl.BlockSpec((tile_t, B, G4), lambda t: (t, 0, 0)),     # precomputed x-gates
        pl.BlockSpec((H, G4), lambda t: (0, 0)),                # raw W_hh^T, resident
    ]
    inputs = [xg, w_hh_t]
    scratch = []
    if apply_dropout:
        if rng_key is None:
            rng_key = jax.random.PRNGKey(0)
        # NOTE: caller must pass a fresh rng_key each training step to match the
        # fresh-mask-per-forward semantics of F.dropout.
        bits = jax.random.bits(rng_key, (H, G4), dtype=jnp.uint32)
        in_specs.append(pl.BlockSpec((H, G4), lambda t: (0, 0)))
        inputs.append(bits)
        scratch.append(pltpu.VMEM((H, G4), matmul_dtype))       # dropped W_hh^T
    scratch += [pltpu.VMEM((B, H), jnp.float32),                # h state
                pltpu.VMEM((B, H), jnp.float32)]                # c state

    kernel = functools.partial(
        _lstm_recurrence_kernel,
        apply_dropout=apply_dropout, drop_thr=drop_thr, drop_scale=drop_scale)

    hseq, c_n = pl.pallas_call(
        kernel,
        out_shape=(jax.ShapeDtypeStruct((T, B, H), x.dtype),
                   jax.ShapeDtypeStruct((B, H), x.dtype)),
        grid=grid,
        in_specs=tuple(in_specs),
        out_specs=(pl.BlockSpec((tile_t, B, H), lambda t: (t, 0, 0)),
                   pl.BlockSpec((B, H), lambda t: (0, 0))),
        scratch_shapes=tuple(scratch),
        # Time axis is sequential. For production v7x, additionally split B across the two
        # TensorCores with a leading "parallel" axis and single-buffer the resident weights.
        compiler_params=pltpu.CompilerParams(dimension_semantics=("arbitrary",)),
    )(*inputs)

    h_n = hseq[-1]
    return hseq, h_n, c_n


# ----------------------------------------------------------------------------
# WeightDropout wrapper
# ----------------------------------------------------------------------------
class WeightDropoutLSTM:
    """WeightDropout(nn.LSTM(I, H), weight_p, layer_names=['weight_hh_l0'])."""

    def __init__(self, params, weight_p, matmul_dtype=jnp.float32):
        self.params = params
        self.weight_p = weight_p
        self.matmul_dtype = matmul_dtype
        self.training = True

    def __call__(self, x, rng_key=None):
        p = self.params
        return weight_dropped_lstm_forward(
            x, p["weight_ih_l0"], p["weight_hh_l0_raw"],
            p["bias_ih_l0"], p["bias_hh_l0"],
            weight_p=self.weight_p, training=self.training,
            rng_key=rng_key, matmul_dtype=self.matmul_dtype)


def lstm_ref(x, w_ih, w_hh, b_ih, b_hh):
    """Pure-JAX reference (PyTorch LSTM semantics)."""
    T, B, _ = x.shape
    H = w_hh.shape[1]

    def step(carry, x_t):
        h, c = carry
        gates = x_t @ w_ih.T + h @ w_hh.T + b_ih + b_hh
        i = jax.nn.sigmoid(gates[:, :H])
        f = jax.nn.sigmoid(gates[:, H:2 * H])
        g = jnp.tanh(gates[:, 2 * H:3 * H])
        o = jax.nn.sigmoid(gates[:, 3 * H:])
        c = f * c + i * g
        h = o * jnp.tanh(c)
        return (h, c), h

    (hn, cn), hs = jax.lax.scan(
        step, (jnp.zeros((B, H), x.dtype), jnp.zeros((B, H), x.dtype)), x)
    return hs, hn, cn


if __name__ == "__main__":
    T, B, I, H = 8, 4, 16, 32
    weight_p = 0.5
    key = jax.random.PRNGKey(0)
    k1, k2, k3, k4, k5 = jax.random.split(key, 5)
    bound = 1.0 / np.sqrt(H)

    params = {
        "weight_ih_l0":     jax.random.uniform(k1, (4 * H, I), jnp.float32, -bound, bound),
        "weight_hh_l0_raw": jax.random.uniform(k2, (4 * H, H), jnp.float32, -bound, bound),
        "bias_ih_l0":       jax.random.uniform(k3, (4 * H,), jnp.float32, -bound, bound),
        "bias_hh_l0":       jax.random.uniform(k4, (4 * H,), jnp.float32, -bound, bound),
    }
    x = jax.random.normal(k5, (T, B, I), jnp.float32)

    model = WeightDropoutLSTM(params, weight_p)

    # --- Eval mode: dropout is identity -> must match the pure-JAX LSTM reference. ---
    model.training = False
    out_eval, hn_eval, cn_eval = model(x)
    ref_seq, ref_hn, ref_cn = lstm_ref(x, params["weight_ih_l0"],
                                       params["weight_hh_l0_raw"],
                                       params["bias_ih_l0"], params["bias_hh_l0"])
    jax.block_until_ready((out_eval, ref_seq))
    np.testing.assert_allclose(np.asarray(out_eval), np.asarray(ref_seq), atol=1e-4, rtol=1e-4)
    np.testing.assert_allclose(np.asarray(hn_eval), np.asarray(ref_hn), atol=1e-4, rtol=1e-4)
    np.testing.assert_allclose(np.asarray(cn_eval), np.asarray(ref_cn), atol=1e-4, rtol=1e-4)

    # --- Training mode: fused weight dropout; verify against reference using the same mask. ---
    model.training = True
    drop_key = jax.random.PRNGKey(42)
    out_tr, hn_tr, cn_tr = model(x, rng_key=drop_key)
    jax.block_until_ready((out_tr, hn_tr, cn_tr))

    bits = jax.random.bits(drop_key, (H, 4 * H), dtype=jnp.uint32)
    thr = int(round(weight_p * (1 << 31)))
    keep = (bits >> 1).astype(jnp.int32) >= jnp.int32(thr)
    w_hh_t_dropped = jnp.where(keep,
                               params["weight_hh_l0_raw"].T * (1.0 / (1.0 - weight_p)),
                               0.0)
    ref_seq_t, ref_hn_t, ref_cn_t = lstm_ref(x, params["weight_ih_l0"], w_hh_t_dropped.T,
                                             params["bias_ih_l0"], params["bias_hh_l0"])
    np.testing.assert_allclose(np.asarray(out_tr), np.asarray(ref_seq_t), atol=1e-4, rtol=1e-4)
    np.testing.assert_allclose(np.asarray(hn_tr), np.asarray(ref_hn_t), atol=1e-4, rtol=1e-4)
    np.testing.assert_allclose(np.asarray(cn_tr), np.asarray(ref_cn_t), atol=1e-4, rtol=1e-4)

    # --- bf16 matmul path (v6e/v7x perf feedback): run + sanity-check only. ---
    model_bf16 = WeightDropoutLSTM(params, weight_p, matmul_dtype=jnp.bfloat16)
    out_bf16, hn_bf16, cn_bf16 = model_bf16(x, rng_key=drop_key)
    jax.block_until_ready(out_bf16)
    assert out_bf16.shape == (T, B, H) and bool(jnp.isfinite(out_bf16).all())

    print("KERNEL_OK")
</pallas_src>

<mosaic_0001>
module attributes {stable_mosaic.version = 11 : i64} {
  func.func @_input_proj_kernel(%arg0: i32, %arg1: memref<32x16xf32, #tpu.memory_space<vmem>>, %arg2: memref<16x128xf32, #tpu.memory_space<vmem>>, %arg3: memref<1x128xf32, #tpu.memory_space<vmem>>, %arg4: memref<32x128xf32, #tpu.memory_space<vmem>>) attributes {dimension_semantics = [#tpu.dimension_semantics<parallel>], iteration_bounds = array<i64: 1>, scalar_prefetch = 0 : i64, scratch_operands = 0 : i64, tpu.core_type = #tpu.core_type<tc>, window_params = [{transform_indices = @transform_0, window_bounds = array<i64: 32, 16>}, {pipeline_mode = #tpu.pipeline_mode<synchronous>, transform_indices = @transform_1, window_bounds = array<i64: 16, 128>}, {pipeline_mode = #tpu.pipeline_mode<synchronous>, transform_indices = @transform_2, window_bounds = array<i64: 1, 128>}, {transform_indices = @transform_3, window_bounds = array<i64: 32, 128>}]} {
    %c0 = arith.constant 0 : index
    %c0_0 = arith.constant 0 : index
    %0 = vector.load %arg1[%c0, %c0_0] : memref<32x16xf32, #tpu.memory_space<vmem>>, vector<32x16xf32>
    %c0_1 = arith.constant 0 : index
    %c0_2 = arith.constant 0 : index
    %1 = vector.load %arg2[%c0_1, %c0_2] : memref<16x128xf32, #tpu.memory_space<vmem>>, vector<16x128xf32>
    %cst = arith.constant dense<0.000000e+00> : vector<32x128xf32>
    %2 = tpu.matmul %0, %1, %cst {dimension_numbers = #tpu.dot_dimension_numbers<[1], [0], [0], [1], [0, 0, 1, 1], [], []>} : vector<32x16xf32>, vector<16x128xf32>, vector<32x128xf32> -> vector<32x128xf32>
    %c0_3 = arith.constant 0 : index
    %c0_4 = arith.constant 0 : index
    %3 = vector.load %arg3[%c0_3, %c0_4] : memref<1x128xf32, #tpu.memory_space<vmem>>, vector<1x128xf32>
    %4 = vector.broadcast %3 : vector<1x128xf32> to vector<32x128xf32>
    %5 = arith.addf %2, %4 : vector<32x128xf32>
    %c0_5 = arith.constant 0 : index
    %c0_6 = arith.constant 0 : index
    %6 = vector.load %arg4[%c0_5, %c0_6] : memref<32x128xf32, #tpu.memory_space<vmem>>, vector<32x128xf32>
    tpu.vector_store %arg4[%c0_5, %c0_6], %5 {strides = array<i32>} : memref<32x128xf32, #tpu.memory_space<vmem>>, vector<32x128xf32>,
    return
  }
  func.func @transform_0(%arg0: i32) -> (i32, i32) {
    %c0_i32 = arith.constant 0 : i32
    %c0_i32_0 = arith.constant 0 : i32
    return %arg0, %c0_i32 : i32, i32
  }
  func.func @transform_1(%arg0: i32) -> (i32, i32) {
    %c0_i32 = arith.constant 0 : i32
    %c0_i32_0 = arith.constant 0 : i32
    %c0_i32_1 = arith.constant 0 : i32
    return %c0_i32, %c0_i32_0 : i32, i32
  }
  func.func @transform_2(%arg0: i32) -> (i32, i32) {
    %c0_i32 = arith.constant 0 : i32
    %c0_i32_0 = arith.constant 0 : i32
    %c0_i32_1 = arith.constant 0 : i32
    return %c0_i32, %c0_i32_0 : i32, i32
  }
  func.func @transform_3(%arg0: i32) -> (i32, i32) {
    %c0_i32 = arith.constant 0 : i32
    %c0_i32_0 = arith.constant 0 : i32
    return %arg0, %c0_i32 : i32, i32
  }
}

</mosaic_0001>

<bundles_post_ra>
// kernel: tpu_custom_call.1
= control target key start
LH: loop header
LB: loop body
LE: loop exit
PB: predicated region body
PF: predicated region fallthrough
CT: control target
= control target key end

     0   :  { %vm28_vm0 = vcmask 130048   ;;  %s256_s0 = inlined_call_operand.vmem [shape: f32[32,16], index: 0, kind: input, shape index: {}]   ;;  %s257_s1 = inlined_call_operand.vmem [shape: f32[16,128], index: 1, kind: input, shape index: {}]   ;;  %s258_s2 = inlined_call_operand.vmem [shape: f32[1,128], index: 2, kind: input, shape index: {}]   ;;  %s259_s3 = inlined_call_operand.hbm [shape: f32[32,128], index: 3, kind: output, shape index: {}]  }
   0x1   :  { %v19_v0 = vld [vmem:[%s257_s1] sm:$0xff]  ;;  %v20_v1 = vld [vmem:[%s257_s1 + $0x8] sm:$0xff]  ;;  %v17_v4 = vld [vmem:[%s256_s0 + $0x10] sm:$0xff] }
   0x2   :  { %v15_v2 = vld [vmem:[%s256_s0] sm:$0xff]  ;;  %v167_v3 = vpack.c.bf16 %v20_v1, %v19_v0  ;;  %164 = vmatprep.mubr.msk.f32.mxu1 %vm28_vm0, %v17_v4 }
   0x3   :  { %161 = vmatprep.mubr.msk.f32.mxu0 %vm28_vm0, %v15_v2 }
   0x4   :  { %8 = vsyncpa [#allocation3], 0  ;;  %168 = vmatprep.subr.bf16.mxu0 %v167_v3  ;;  %171 = vmatprep.subr.bf16.mxu1 %v167_v3  ;;  %v16_v5 = vld [vmem:[%s256_s0 + $0x8] sm:$0xff]  ;;  %v18_v6 = vld [vmem:[%s256_s0 + $0x18] sm:$0xff]  ;;  %s200_s25 = smov [#allocation2]  }
   0x5   :  { %170 = vmatpush3.bf16.msra.mxu0 %v167_v3  ;;  %172 = vmatpush3.bf16.msra.mxu1 %v167_v3  ;;  %v146_v7 = vld [vmem:[%s258_s2] ss:$0 sm:$0xff]  ;;  %s135_s26 = sshll.u32 %s200_s25, 4  ;;  %s136_s26 = int_to_ptr.vmem [resolvable:$true] %s135_s26 }
   0x6   :  { %s176_s0 = scalar_lea.vmem %s136_s26, 512  ;;  %p181_p1 = scmp.lt.s32.totalorder %s136_s26, %s136_s26 }
   0x7   :  { %p177_p0 = scmp.ne.s32.totalorder %s136_s26, %s176_s0  ;;  %p182_p2 = scmp.lt.s32.totalorder %s176_s0, %s176_s0 }
   0x8   :  { %162 = vmatmul.mubr.msk.f32.vlgmr.msra.gmra.mrb[0].mxu0 %vm28_vm0, %v16_v5  ;;  %165 = vmatmul.mubr.msk.f32.vlgmr.msra.gmra.mrb[0].mxu1 %vm28_vm0, %v18_v6 }
   0x9   :  { %p183_p3 = por %p182_p2, %p181_p1 }
   0xb   :  { %p184_p4 = pnand %p183_p3, %p177_p0 }
  0xdb   :  { %v163_v8 = vpop.f32.mrb[0].mxu0  ;;  %v166_v9 = vpop.f32.mrb[0].mxu1 }
  0xdc   :  { %v113_v10 = vadd.f32 %v163_v8, %v146_v7  ;;  %v123_v11 = vadd.f32 %v166_v9, %v146_v7  ;;  %v107_v12 = vpop.f32.mrb[1].mxu0  ;;  %v117_v13 = vpop.f32.mrb[1].mxu1 }
  0xdd   :  { %v108_v14 = vadd.f32 %v146_v7, %v107_v12  ;;  %v118_v15 = vadd.f32 %v146_v7, %v117_v13 }
  0xde   :  { %127 = vst [vmem:[#allocation2 + $0x8] sm:$0xff] %v113_v10  ;;  %129 = vst [vmem:[#allocation2 + $0x18] sm:$0xff] %v123_v11 }
  0xdf   :  { %126 = vst [vmem:[#allocation2] sm:$0xff] %v108_v14  ;;  %128 = vst [vmem:[#allocation2 + $0x10] sm:$0xff] %v118_v15 }
  0xe0   :  { %187 = shalt.err (!%p184_p4)
}
  0xe1   :  { %s188_s28 = scalar_lea.hbm %s259_s3, 512 }
  0xe2   :  { %p189_p5 = scmp.ne.s32.totalorder %s259_s3, %s188_s28  ;;  %p192_p6 = scmp.lt.u32.totalorder %s188_s28, %s259_s3 }
  0xe4   :  { %p194_p7 = pnand %p192_p6, %p189_p5 }
  0xe6   :  { %197 = shalt.err (!%p194_p7)
}
  0xe7   :  { %s201_s6 = smov 128   ;;  %s202_s7 = smov 8  }
  0xe8   :  { %141 = dma.vmem_to_hbm [thread:$0]  %s136_s26, 512, %s259_s3, [#allocation3], %s201_s6, %s201_s6, %s202_s7  }
  0xe9   :  { %198 = dma.done.wait [#allocation3], 512  }
  0xea   :  { %199 = vsyncadd [#allocation3], 4294966784 }
  0xeb   :  { %145 = vsyncpa [#allocation3], 1 }

</bundles_post_ra>
